<compile_context>
chip_gen: v6e
topology: v6e:2x2x1
jax: 0.10.0
libtpu: 0.0.40
codegen_flags: <defaults>
</compile_context>

<pallas_src>
import jax
import jax.numpy as jnp
from jax import lax
from jax.experimental import pallas as pl
from jax.experimental.pallas import tpu as pltpu


def _vmem_limit_bytes():
    """Chip-aware VMEM budget: ~3/4 of physical capacity, conservative fallback."""
    cap = 64 << 20  # v7x-sized fallback if the query is unavailable
    try:
        info = pltpu.get_tpu_info()
        cap = int(getattr(info, "vmem_capacity_bytes", cap)) or cap
    except Exception:
        pass
    return min((cap * 3) // 4, 100 << 20)  # 48 MiB on v7x, 96 MiB on v5e/v6e


def _pick_tile_n(D, N, itemsize, vmem_limit):
    """Largest lane-aligned column tile whose double-buffered working set fits."""
    d_pad = ((D + 7) // 8) * 8
    scratch_bytes = 2 * d_pad * 128 * 4            # two (D, 128) f32 accumulators
    avail = max(vmem_limit - scratch_bytes - (4 << 20), 1 << 20)
    per_block = min(avail // 4, 8 << 20)           # 2 operands x 2 pipeline buffers
    max_cols = max(per_block // (D * itemsize), 128)
    max_cols = min(max_cols, 16384)                # bound trace-time unrolling
    if max_cols >= N:
        return N                                   # single exact-width tile, no mask
    return max(128, (max_cols // 128) * 128)


def _make_intra_kernel(D, N, tile_n, lane_w, nj, nj_per_core, need_mask):
    n_groups = tile_n // lane_w

    def kernel(pos_ref, neg_ref, s_out_ref, cnt_out_ref, s_pos, s_neg, c_pos, c_neg):
        j = pl.program_id(1)

        @pl.when(j == 0)
        def _init():
            s_pos[...] = jnp.zeros_like(s_pos)
            s_neg[...] = jnp.zeros_like(s_neg)
            c_pos[...] = jnp.zeros_like(c_pos)
            c_neg[...] = jnp.zeros_like(c_neg)

        if need_mask:
            # Logical column-tile index for this core/step; columns past N (ragged
            # last tile or a clamped overhang tile) are zeroed before any math.
            g = pl.program_id(0) * nj_per_core + j
            lane = lax.broadcasted_iota(jnp.int32, (1, tile_n), 1)
            col_mask = (g * tile_n + lane) < N                  # (1, tile_n)
        else:
            col_mask = None

        def accumulate(x_ref, s_acc, c_acc):
            x = x_ref[...].astype(jnp.float32)                  # (D, tile_n)
            if col_mask is not None:
                x = jnp.where(col_mask, x, 0.0)
            sumsq = jnp.sum(x * x, axis=0, keepdims=True)       # (1, tile_n)
            valid = sumsq > 0.0                                 # zero columns skipped
            inv = jnp.where(valid, lax.rsqrt(sumsq), 0.0)       # EUP rsqrt, no divide
            xn = x * inv                                        # unit-norm (or 0) cols
            # Lane-dense accumulation: static 128-wide slices -> pure VALU adds;
            # the cross-lane XLU reduce is deferred to the finalize.
            part = xn[:, 0:lane_w]
            for i in range(1, n_groups):
                part = part + xn[:, i * lane_w:(i + 1) * lane_w]
            s_acc[...] += part
            # trace == number of valid (nonzero, in-range) columns.
            c_acc[...] += jnp.sum(valid.astype(jnp.float32), keepdims=True)

        accumulate(pos_ref, s_pos, c_pos)
        accumulate(neg_ref, s_neg, c_neg)

        @pl.when(j == pl.num_programs(1) - 1)
        def _finalize():
            s_out_ref[0, 0] = jnp.sum(s_pos[...], axis=1, keepdims=True)   # (D, 1)
            s_out_ref[0, 1] = jnp.sum(s_neg[...], axis=1, keepdims=True)
            cnt_out_ref[0, 0] = c_pos[...]                                 # (1, 1)
            cnt_out_ref[0, 1] = c_neg[...]

    return kernel


def intra_loss(pos, neg, delta):
    """pos, neg: (D, N) feature matrices (one sample per column). Scalar f32 loss."""
    D, N = pos.shape
    assert neg.shape == (D, N), (pos.shape, neg.shape)

    itemsize = jnp.dtype(pos.dtype).itemsize
    vmem_limit = _vmem_limit_bytes()
    tile_n = _pick_tile_n(D, N, itemsize, vmem_limit)
    lane_w = 128 if tile_n % 128 == 0 else tile_n

    nj = pl.cdiv(N, tile_n)              # total column tiles
    P = 2 if nj >= 2 else 1              # split the tile range across 2 TCs (v7x)
    nj_per_core = pl.cdiv(nj, P)
    need_mask = (N % tile_n != 0) or (P * nj_per_core != nj)

    kernel = _make_intra_kernel(D, N, tile_n, lane_w, nj, nj_per_core, need_mask)

    def col_block(p, j):
        # Clamp so an odd tile count never issues an out-of-range DMA; the
        # in-kernel mask zeroes everything in such an overhang tile.
        return (0, jnp.minimum(p * nj_per_core + j, nj - 1))

    cost = pl.CostEstimate(
        flops=int(10 * D * N),
        transcendentals=int(2 * N),
        bytes_accessed=int(2 * D * N * itemsize),
    )

    s_out, cnt_out = pl.pallas_call(
        kernel,
        out_shape=(
            jax.ShapeDtypeStruct((P, 2, D, 1), jnp.float32),   # per-core column sums
            jax.ShapeDtypeStruct((P, 2, 1, 1), jnp.float32),   # per-core valid counts
        ),
        grid_spec=pltpu.PrefetchScalarGridSpec(
            num_scalar_prefetch=0,
            grid=(P, nj_per_core),
            in_specs=[
                pl.BlockSpec((D, tile_n), col_block),          # pos
                pl.BlockSpec((D, tile_n), col_block),          # neg
            ],
            out_specs=[
                pl.BlockSpec((1, 2, D, 1), lambda p, j: (p, 0, 0, 0)),
                pl.BlockSpec((1, 2, 1, 1), lambda p, j: (p, 0, 0, 0)),
            ],
            scratch_shapes=[
                pltpu.VMEM((D, lane_w), jnp.float32),          # pos running col-sums
                pltpu.VMEM((D, lane_w), jnp.float32),          # neg running col-sums
                pltpu.VMEM((1, 1), jnp.float32),               # pos valid-column count
                pltpu.VMEM((1, 1), jnp.float32),               # neg valid-column count
            ],
        ),
        compiler_params=pltpu.CompilerParams(
            dimension_semantics=("parallel", "arbitrary"),
            vmem_limit_bytes=int(vmem_limit),
        ),
        cost_estimate=cost,
    )(pos, neg)

    # Combine per-core partials: column-sum VECTORS must be added across cores
    # before squaring (the cross term between cores does not vanish).
    s = jnp.sum(s_out[..., 0], axis=0)            # (2, D)
    ssq = jnp.sum(s * s, axis=-1)                 # (2,)  ||sum of unit columns||^2
    cnt = jnp.sum(cnt_out[:, :, 0, 0], axis=0)    # (2,)  trace == #nonzero columns
    # Per operand: sum_triu(gram) = (ssq - trace)/2; delta folds to delta*N(N-1)/2
    # per operand -> delta*N(N-1) total, applied outside the kernel.
    loss = 0.5 * jnp.sum(ssq - cnt) - jnp.asarray(delta, jnp.float32) * (N * (N - 1))
    # torch: `return loss if loss > 0 else 0`
    return jnp.maximum(loss, jnp.float32(0.0))


def _intra_loss_ref(pos, neg, delta):
    """Direct transcription of the PyTorch module (gram + strict upper)."""
    def term(x):
        x = x.astype(jnp.float32)
        xn = x / jnp.linalg.norm(x, axis=0, keepdims=True)
        gram = xn.T @ xn - delta
        return jnp.sum(jnp.triu(gram, k=1))

    return jnp.maximum(term(pos) + term(neg), 0.0)


if __name__ == "__main__":
    key = jax.random.PRNGKey(0)
    k1, k2 = jax.random.split(key)
    D, N = 32, 16          # feature dim, number of samples
    pos = jax.random.normal(k1, (D, N), dtype=jnp.float32)
    neg = jax.random.normal(k2, (D, N), dtype=jnp.float32)

    loss_fn = jax.jit(intra_loss)
    # Two delta values exercise both the clamped-to-zero and positive branches
    # of the final relu; delta is a traced scalar so there is no recompile.
    for delta in (0.1, -1.0):
        out = jax.block_until_ready(loss_fn(pos, neg, jnp.float32(delta)))
        ref = jax.block_until_ready(_intra_loss_ref(pos, neg, delta))
        assert jnp.allclose(out, ref, rtol=1e-4, atol=1e-3), (delta, out, ref)

    print("KERNEL_OK")
</pallas_src>

<mosaic_0001>
module attributes {stable_mosaic.version = 11 : i64} {
  func.func @kernel(%arg0: i32, %arg1: i32, %arg2: memref<32x16xf32, #tpu.memory_space<vmem>>, %arg3: memref<32x16xf32, #tpu.memory_space<vmem>>, %arg4: memref<1x2x32x1xf32, #tpu.memory_space<vmem>>, %arg5: memref<1x2x1x1xf32, #tpu.memory_space<vmem>>, %arg6: memref<32x16xf32, #tpu.memory_space<vmem>>, %arg7: memref<32x16xf32, #tpu.memory_space<vmem>>, %arg8: memref<1x1xf32, #tpu.memory_space<vmem>>, %arg9: memref<1x1xf32, #tpu.memory_space<vmem>>) attributes {dimension_semantics = [#tpu.dimension_semantics<parallel>, #tpu.dimension_semantics<arbitrary>], iteration_bounds = array<i64: 1, 1>, scalar_prefetch = 0 : i64, scratch_operands = 4 : i64, tpu.core_type = #tpu.core_type<tc>, window_params = [{transform_indices = @transform_0, window_bounds = array<i64: 32, 16>}, {transform_indices = @transform_1, window_bounds = array<i64: 32, 16>}, {transform_indices = @transform_2, window_bounds = array<i64: 1, 2, 32, 1>}, {transform_indices = @transform_3, window_bounds = array<i64: 1, 2, 1, 1>}]} {
    %c0_i32 = arith.constant 0 : i32
    %0 = arith.cmpi eq, %arg1, %c0_i32 : i32
    %1 = arith.extui %0 : i1 to i32
    %c0_i32_0 = arith.constant 0 : i32
    %2 = arith.cmpi ne, %1, %c0_i32_0 : i32
    scf.if %2 {
      %cst_29 = arith.constant 0.000000e+00 : f32
      %54 = vector.broadcast %cst_29 : f32 to vector<32x16xf32>
      %c0_30 = arith.constant 0 : index
      %c0_31 = arith.constant 0 : index
      %55 = vector.load %arg6[%c0_30, %c0_31] : memref<32x16xf32, #tpu.memory_space<vmem>>, vector<32x16xf32>
      tpu.vector_store %arg6[%c0_30, %c0_31], %54 {strides = array<i32>} : memref<32x16xf32, #tpu.memory_space<vmem>>, vector<32x16xf32>,
      %cst_32 = arith.constant 0.000000e+00 : f32
      %56 = vector.broadcast %cst_32 : f32 to vector<32x16xf32>
      %c0_33 = arith.constant 0 : index
      %c0_34 = arith.constant 0 : index
      %57 = vector.load %arg7[%c0_33, %c0_34] : memref<32x16xf32, #tpu.memory_space<vmem>>, vector<32x16xf32>
      tpu.vector_store %arg7[%c0_33, %c0_34], %56 {strides = array<i32>} : memref<32x16xf32, #tpu.memory_space<vmem>>, vector<32x16xf32>,
      %cst_35 = arith.constant 0.000000e+00 : f32
      %58 = vector.broadcast %cst_35 : f32 to vector<1x1xf32>
      %c0_36 = arith.constant 0 : index
      %c0_37 = arith.constant 0 : index
      %59 = vector.load %arg8[%c0_36, %c0_37] : memref<1x1xf32, #tpu.memory_space<vmem>>, vector<1x1xf32>
      tpu.vector_store %arg8[%c0_36, %c0_37], %58 {strides = array<i32>} : memref<1x1xf32, #tpu.memory_space<vmem>>, vector<1x1xf32>,
      %cst_38 = arith.constant 0.000000e+00 : f32
      %60 = vector.broadcast %cst_38 : f32 to vector<1x1xf32>
      %c0_39 = arith.constant 0 : index
      %c0_40 = arith.constant 0 : index
      %61 = vector.load %arg9[%c0_39, %c0_40] : memref<1x1xf32, #tpu.memory_space<vmem>>, vector<1x1xf32>
      tpu.vector_store %arg9[%c0_39, %c0_40], %60 {strides = array<i32>} : memref<1x1xf32, #tpu.memory_space<vmem>>, vector<1x1xf32>,
    } else {
    }
    %c0 = arith.constant 0 : index
    %c0_1 = arith.constant 0 : index
    %3 = vector.load %arg2[%c0, %c0_1] : memref<32x16xf32, #tpu.memory_space<vmem>>, vector<32x16xf32>
    %4 = arith.mulf %3, %3 : vector<32x16xf32>
    %cst = arith.constant dense<0.000000e+00> : vector<16xf32>
    %5 = vector.multi_reduction <add>, %4, %cst [0] : vector<32x16xf32> to vector<16xf32>
    %6 = vector.shape_cast %5 : vector<16xf32> to vector<1x16xf32>
    %cst_2 = arith.constant 0.000000e+00 : f32
    %7 = vector.broadcast %cst_2 : f32 to vector<1x16xf32>
    %8 = arith.cmpf ogt, %6, %7 : vector<1x16xf32>
    %9 = math.rsqrt %6 : vector<1x16xf32>
    %cst_3 = arith.constant 0.000000e+00 : f32
    %10 = vector.broadcast %cst_3 : f32 to vector<1x16xf32>
    %11 = arith.select %8, %9, %10 : vector<1x16xi1>, vector<1x16xf32>
    %12 = vector.broadcast %11 : vector<1x16xf32> to vector<32x16xf32>
    %13 = arith.mulf %3, %12 : vector<32x16xf32>
    %c0_4 = arith.constant 0 : index
    %c0_5 = arith.constant 0 : index
    %14 = vector.load %arg6[%c0_4, %c0_5] : memref<32x16xf32, #tpu.memory_space<vmem>>, vector<32x16xf32>
    %15 = arith.addf %14, %13 : vector<32x16xf32>
    %c0_6 = arith.constant 0 : index
    %c0_7 = arith.constant 0 : index
    %16 = vector.load %arg6[%c0_6, %c0_7] : memref<32x16xf32, #tpu.memory_space<vmem>>, vector<32x16xf32>
    tpu.vector_store %arg6[%c0_6, %c0_7], %15 {strides = array<i32>} : memref<32x16xf32, #tpu.memory_space<vmem>>, vector<32x16xf32>,
    %c0_8 = arith.constant 0 : index
    %c0_9 = arith.constant 0 : index
    %17 = vector.load %arg8[%c0_8, %c0_9] : memref<1x1xf32, #tpu.memory_space<vmem>>, vector<1x1xf32>
    %18 = arith.extui %8 : vector<1x16xi1> to vector<1x16xi32>
    %19 = arith.sitofp %18 : vector<1x16xi32> to vector<1x16xf32>
    %20 = vector.shape_cast %19 : vector<1x16xf32> to vector<1x1x16xf32>
    %cst_10 = arith.constant dense<0.000000e+00> : vector<1xf32>
    %21 = vector.multi_reduction <add>, %20, %cst_10 [1, 2] : vector<1x1x16xf32> to vector<1xf32>
    %22 = vector.shape_cast %21 : vector<1xf32> to vector<1x1x1xf32>
    %23 = vector.extract %22[0, 0, 0] : f32 from vector<1x1x1xf32>
    %24 = vector.broadcast %23 : f32 to vector<1x1xf32>
    %25 = arith.addf %17, %24 : vector<1x1xf32>
    %c0_11 = arith.constant 0 : index
    %c0_12 = arith.constant 0 : index
    %26 = vector.load %arg8[%c0_11, %c0_12] : memref<1x1xf32, #tpu.memory_space<vmem>>, vector<1x1xf32>
    tpu.vector_store %arg8[%c0_11, %c0_12], %25 {strides = array<i32>} : memref<1x1xf32, #tpu.memory_space<vmem>>, vector<1x1xf32>,
    %c0_13 = arith.constant 0 : index
    %c0_14 = arith.constant 0 : index
    %27 = vector.load %arg3[%c0_13, %c0_14] : memref<32x16xf32, #tpu.memory_space<vmem>>, vector<32x16xf32>
    %28 = arith.mulf %27, %27 : vector<32x16xf32>
    %cst_15 = arith.constant dense<0.000000e+00> : vector<16xf32>
    %29 = vector.multi_reduction <add>, %28, %cst_15 [0] : vector<32x16xf32> to vector<16xf32>
    %30 = vector.shape_cast %29 : vector<16xf32> to vector<1x16xf32>
    %cst_16 = arith.constant 0.000000e+00 : f32
    %31 = vector.broadcast %cst_16 : f32 to vector<1x16xf32>
    %32 = arith.cmpf ogt, %30, %31 : vector<1x16xf32>
    %33 = math.rsqrt %30 : vector<1x16xf32>
    %cst_17 = arith.constant 0.000000e+00 : f32
    %34 = vector.broadcast %cst_17 : f32 to vector<1x16xf32>
    %35 = arith.select %32, %33, %34 : vector<1x16xi1>, vector<1x16xf32>
    %36 = vector.broadcast %35 : vector<1x16xf32> to vector<32x16xf32>
    %37 = arith.mulf %27, %36 : vector<32x16xf32>
    %c0_18 = arith.constant 0 : index
    %c0_19 = arith.constant 0 : index
    %38 = vector.load %arg7[%c0_18, %c0_19] : memref<32x16xf32, #tpu.memory_space<vmem>>, vector<32x16xf32>
    %39 = arith.addf %38, %37 : vector<32x16xf32>
    %c0_20 = arith.constant 0 : index
    %c0_21 = arith.constant 0 : index
    %40 = vector.load %arg7[%c0_20, %c0_21] : memref<32x16xf32, #tpu.memory_space<vmem>>, vector<32x16xf32>
    tpu.vector_store %arg7[%c0_20, %c0_21], %39 {strides = array<i32>} : memref<32x16xf32, #tpu.memory_space<vmem>>, vector<32x16xf32>,
    %c0_22 = arith.constant 0 : index
    %c0_23 = arith.constant 0 : index
    %41 = vector.load %arg9[%c0_22, %c0_23] : memref<1x1xf32, #tpu.memory_space<vmem>>, vector<1x1xf32>
    %42 = arith.extui %32 : vector<1x16xi1> to vector<1x16xi32>
    %43 = arith.sitofp %42 : vector<1x16xi32> to vector<1x16xf32>
    %44 = vector.shape_cast %43 : vector<1x16xf32> to vector<1x1x16xf32>
    %cst_24 = arith.constant dense<0.000000e+00> : vector<1xf32>
    %45 = vector.multi_reduction <add>, %44, %cst_24 [1, 2] : vector<1x1x16xf32> to vector<1xf32>
    %46 = vector.shape_cast %45 : vector<1xf32> to vector<1x1x1xf32>
    %47 = vector.extract %46[0, 0, 0] : f32 from vector<1x1x1xf32>
    %48 = vector.broadcast %47 : f32 to vector<1x1xf32>
    %49 = arith.addf %41, %48 : vector<1x1xf32>
    %c0_25 = arith.constant 0 : index
    %c0_26 = arith.constant 0 : index
    %50 = vector.load %arg9[%c0_25, %c0_26] : memref<1x1xf32, #tpu.memory_space<vmem>>, vector<1x1xf32>
    tpu.vector_store %arg9[%c0_25, %c0_26], %49 {strides = array<i32>} : memref<1x1xf32, #tpu.memory_space<vmem>>, vector<1x1xf32>,
    %c0_i32_27 = arith.constant 0 : i32
    %51 = arith.cmpi eq, %arg1, %c0_i32_27 : i32
    %52 = arith.extui %51 : i1 to i32
    %c0_i32_28 = arith.constant 0 : i32
    %53 = arith.cmpi ne, %52, %c0_i32_28 : i32
    scf.if %53 {
      %c0_29 = arith.constant 0 : index
      %c0_30 = arith.constant 0 : index
      %54 = vector.load %arg6[%c0_29, %c0_30] : memref<32x16xf32, #tpu.memory_space<vmem>>, vector<32x16xf32>
      %cst_31 = arith.constant dense<0.000000e+00> : vector<32xf32>
      %55 = vector.multi_reduction <add>, %54, %cst_31 [1] : vector<32x16xf32> to vector<32xf32>
      %56 = vector.shape_cast %55 : vector<32xf32> to vector<32x1xf32>
      %c0_32 = arith.constant 0 : index
      %c0_33 = arith.constant 0 : index
      %c0_34 = arith.constant 0 : index
      %c0_35 = arith.constant 0 : index
      %57 = vector.load %arg4[%c0_32, %c0_33, %c0_34, %c0_35] : memref<1x2x32x1xf32, #tpu.memory_space<vmem>>, vector<1x1x32x1xf32>
      %58 = vector.shape_cast %57 : vector<1x1x32x1xf32> to vector<32x1xf32>
      %59 = vector.shape_cast %56 : vector<32x1xf32> to vector<1x1x32x1xf32>
      tpu.vector_store %arg4[%c0_32, %c0_33, %c0_34, %c0_35], %59 {strides = array<i32>} : memref<1x2x32x1xf32, #tpu.memory_space<vmem>>, vector<1x1x32x1xf32>,
      %c0_36 = arith.constant 0 : index
      %c0_37 = arith.constant 0 : index
      %60 = vector.load %arg7[%c0_36, %c0_37] : memref<32x16xf32, #tpu.memory_space<vmem>>, vector<32x16xf32>
      %cst_38 = arith.constant dense<0.000000e+00> : vector<32xf32>
      %61 = vector.multi_reduction <add>, %60, %cst_38 [1] : vector<32x16xf32> to vector<32xf32>
      %62 = vector.shape_cast %61 : vector<32xf32> to vector<32x1xf32>
      %c0_39 = arith.constant 0 : index
      %c1 = arith.constant 1 : index
      %c0_40 = arith.constant 0 : index
      %c0_41 = arith.constant 0 : index
      %63 = vector.load %arg4[%c0_39, %c1, %c0_40, %c0_41] : memref<1x2x32x1xf32, #tpu.memory_space<vmem>>, vector<1x1x32x1xf32>
      %64 = vector.shape_cast %63 : vector<1x1x32x1xf32> to vector<32x1xf32>
      %65 = vector.shape_cast %62 : vector<32x1xf32> to vector<1x1x32x1xf32>
      tpu.vector_store %arg4[%c0_39, %c1, %c0_40, %c0_41], %65 {strides = array<i32>} : memref<1x2x32x1xf32, #tpu.memory_space<vmem>>, vector<1x1x32x1xf32>,
      %c0_42 = arith.constant 0 : index
      %c0_43 = arith.constant 0 : index
      %66 = vector.load %arg8[%c0_42, %c0_43] : memref<1x1xf32, #tpu.memory_space<vmem>>, vector<1x1xf32>
      %c0_44 = arith.constant 0 : index
      %c0_45 = arith.constant 0 : index
      %c0_46 = arith.constant 0 : index
      %c0_47 = arith.constant 0 : index
      %67 = vector.load %arg5[%c0_44, %c0_45, %c0_46, %c0_47] : memref<1x2x1x1xf32, #tpu.memory_space<vmem>>, vector<1x1x1x1xf32>
      %68 = vector.shape_cast %67 : vector<1x1x1x1xf32> to vector<1x1xf32>
      %69 = vector.shape_cast %66 : vector<1x1xf32> to vector<1x1x1x1xf32>
      tpu.vector_store %arg5[%c0_44, %c0_45, %c0_46, %c0_47], %69 {strides = array<i32>} : memref<1x2x1x1xf32, #tpu.memory_space<vmem>>, vector<1x1x1x1xf32>,
      %c0_48 = arith.constant 0 : index
      %c0_49 = arith.constant 0 : index
      %70 = vector.load %arg9[%c0_48, %c0_49] : memref<1x1xf32, #tpu.memory_space<vmem>>, vector<1x1xf32>
      %c0_50 = arith.constant 0 : index
      %c1_51 = arith.constant 1 : index
      %c0_52 = arith.constant 0 : index
      %c0_53 = arith.constant 0 : index
      %71 = vector.load %arg5[%c0_50, %c1_51, %c0_52, %c0_53] : memref<1x2x1x1xf32, #tpu.memory_space<vmem>>, vector<1x1x1x1xf32>
      %72 = vector.shape_cast %71 : vector<1x1x1x1xf32> to vector<1x1xf32>
      %73 = vector.shape_cast %70 : vector<1x1xf32> to vector<1x1x1x1xf32>
      tpu.vector_store %arg5[%c0_50, %c1_51, %c0_52, %c0_53], %73 {strides = array<i32>} : memref<1x2x1x1xf32, #tpu.memory_space<vmem>>, vector<1x1x1x1xf32>,
    } else {
    }
    return
  }
  func.func @transform_0(%arg0: i32, %arg1: i32) -> (i32, i32) {
    %c1_i32 = arith.constant 1 : i32
    %0 = arith.muli %arg0, %c1_i32 : i32
    %1 = arith.addi %0, %arg1 : i32
    %c0_i32 = arith.constant 0 : i32
    %2 = arith.minsi %1, %c0_i32 : i32
    %c0_i32_0 = arith.constant 0 : i32
    %c0_i32_1 = arith.constant 0 : i32
    return %c0_i32_0, %2 : i32, i32
  }
  func.func @transform_1(%arg0: i32, %arg1: i32) -> (i32, i32) {
    %c1_i32 = arith.constant 1 : i32
    %0 = arith.muli %arg0, %c1_i32 : i32
    %1 = arith.addi %0, %arg1 : i32
    %c0_i32 = arith.constant 0 : i32
    %2 = arith.minsi %1, %c0_i32 : i32
    %c0_i32_0 = arith.constant 0 : i32
    %c0_i32_1 = arith.constant 0 : i32
    return %c0_i32_0, %2 : i32, i32
  }
  func.func @transform_2(%arg0: i32, %arg1: i32) -> (i32, i32, i32, i32) {
    %c0_i32 = arith.constant 0 : i32
    %c0_i32_0 = arith.constant 0 : i32
    %c0_i32_1 = arith.constant 0 : i32
    %c0_i32_2 = arith.constant 0 : i32
    return %arg0, %c0_i32, %c0_i32_0, %c0_i32_1 : i32, i32, i32, i32
  }
  func.func @transform_3(%arg0: i32, %arg1: i32) -> (i32, i32, i32, i32) {
    %c0_i32 = arith.constant 0 : i32
    %c0_i32_0 = arith.constant 0 : i32
    %c0_i32_1 = arith.constant 0 : i32
    %c0_i32_2 = arith.constant 0 : i32
    return %arg0, %c0_i32, %c0_i32_0, %c0_i32_1 : i32, i32, i32, i32
  }
}

</mosaic_0001>

<bundles_post_ra>
// kernel: intra_loss.1
= control target key start
LH: loop header
LB: loop body
LE: loop exit
PB: predicated region body
PF: predicated region fallthrough
CT: control target
= control target key end

     0   :  { %vm71_vm0 = vcmask 130048   ;;  %v284_v0 = vmov 0.0   ;;  %vm127_vm1 = vcmask 122880   ;;  %vm80_vm4 = vcmask 0   ;;  %s456_s0 = inlined_call_operand.vmem [shape: f32[32,16], index: 0, kind: input, shape index: {}]   ;;  %s457_s1 = inlined_call_operand.vmem [shape: f32[32,16], index: 1, kind: input, shape index: {}]   ;;  %s458_s2 = inlined_call_operand.vmem [shape: f32[1,2,32,1], index: 2, kind: output, shape index: {0}]   ;;  %s459_s3 = inlined_call_operand.vmem [shape: f32[1,2,1,1], index: 3, kind: output, shape index: {1}]  }
   0x1   :  { %72 = vst.msk [vmem:[#allocation2] sm:$0xff] %vm71_vm0, %v284_v0  ;;  %73 = vst.msk [vmem:[#allocation2 + $0x8] sm:$0xff] %vm71_vm0, %v284_v0  ;;  %v316_v1 = vld [vmem:[%s456_s0] sm:$0xff]  ;;  %v321_v2 = vld [vmem:[%s456_s0 + $0x8] sm:$0xff]  ;;  %vm217_vm5 = vcmask 7168  }
   0x2   :  { %74 = vst.msk [vmem:[#allocation2 + $0x10] sm:$0xff] %vm71_vm0, %v284_v0  ;;  %75 = vst.msk [vmem:[#allocation2 + $0x18] sm:$0xff] %vm71_vm0, %v284_v0  ;;  %v326_v3 = vld [vmem:[%s456_s0 + $0x10] sm:$0xff]  ;;  %v86_v4 = vld [vmem:[%s456_s0 + $0x18] sm:$0xff]  ;;  %v87_v5 = vmul.f32 %v316_v1, %v316_v1  ;;  %v88_v6 = vmul.f32 %v321_v2, %v321_v2 }
   0x3   :  { %76 = vst.msk [vmem:[#allocation3] sm:$0xff] %vm71_vm0, %v284_v0  ;;  %77 = vst.msk [vmem:[#allocation3 + $0x8] sm:$0xff] %vm71_vm0, %v284_v0  ;;  %v89_v7 = vmul.f32 %v326_v3, %v326_v3  ;;  %v348_v8 = vld [vmem:[%s457_s1] sm:$0xff]  ;;  %v353_v9 = vld [vmem:[%s457_s1 + $0x8] sm:$0xff]  ;;  %v90_v10 = vmul.f32 %v86_v4, %v86_v4 }
   0x4   :  { %78 = vst.msk [vmem:[#allocation3 + $0x10] sm:$0xff] %vm71_vm0, %v284_v0  ;;  %79 = vst.msk [vmem:[#allocation3 + $0x18] sm:$0xff] %vm71_vm0, %v284_v0  ;;  %v358_v11 = vld [vmem:[%s457_s1 + $0x10] sm:$0xff]  ;;  %v363_v12 = vld [vmem:[%s457_s1 + $0x18] sm:$0xff]  ;;  %v146_v13 = vmul.f32 %v348_v8, %v348_v8  ;;  %v147_v14 = vmul.f32 %v353_v9, %v353_v9  ;;  %v92_v15 = vsel %vm71_vm0, %v87_v5, 0.0  ;;  %v93_v16 = vsel %vm71_vm0, %v88_v6, 0.0 }
   0x5   :  { %v95_v17 = vsel %vm71_vm0, %v89_v7, 0.0  ;;  %v148_v18 = vmul.f32 %v358_v11, %v358_v11  ;;  %v94_v19 = vadd.f32 %v93_v16, %v92_v15  ;;  %v149_v20 = vmul.f32 %v363_v12, %v363_v12  ;;  %81 = vst.msk [vmem:[#allocation4] sm:$0x1] %vm80_vm4, %v284_v0  ;;  %82 = vst.msk [vmem:[#allocation5] sm:$0x1] %vm80_vm4, %v284_v0 }
   0x6   :  { %v150_v21 = vsel %vm71_vm0, %v146_v13, 0.0  ;;  %v97_v22 = vsel %vm71_vm0, %v90_v10, 0.0  ;;  %v151_v23 = vsel %vm71_vm0, %v147_v14, 0.0 }
   0x7   :  { %v153_v24 = vsel %vm71_vm0, %v148_v18, 0.0  ;;  %v96_v25 = vadd.f32 %v95_v17, %v94_v19  ;;  %v152_v26 = vadd.f32 %v151_v23, %v150_v21  ;;  %v155_v27 = vsel %vm71_vm0, %v149_v20, 0.0 }
   0x8   :  { %v112_v48 = vld [vmem:[#allocation2] sm:$0xff]  ;;  %v113_v49 = vld [vmem:[#allocation2 + $0x8] sm:$0xff] }
   0x9   :  { %v98_v28 = vadd.f32 %v97_v22, %v96_v25  ;;  %v154_v29 = vadd.f32 %v153_v24, %v152_v26  ;;  %v114_v50 = vld [vmem:[#allocation2 + $0x10] sm:$0xff]  ;;  %v115_v51 = vld [vmem:[#allocation2 + $0x18] sm:$0xff] }
   0xa   :  { %v170_v59 = vld [vmem:[#allocation3] sm:$0xff]  ;;  %v171_v5 = vld [vmem:[#allocation3 + $0x8] sm:$0xff] }
   0xb   :  { %v99_v30 = vrot.slane %v98_v28, 4  ;;  %v156_v31 = vadd.f32 %v155_v27, %v154_v29  ;;  %v172_v6 = vld [vmem:[#allocation3 + $0x10] sm:$0xff]  ;;  %v173_v7 = vld [vmem:[#allocation3 + $0x18] sm:$0xff] }
   0xd   :  { %v100_v32 = vadd.f32 %v99_v30, %v98_v28  ;;  %v157_v33 = vrot.slane %v156_v31, 4 }
   0xf   :  { %v101_v34 = vrot.slane %v100_v32, 2  ;;  %v158_v35 = vadd.f32 %v157_v33, %v156_v31 }
  0x11   :  { %v102_v36 = vadd.f32 %v101_v34, %v100_v32  ;;  %v159_v37 = vrot.slane %v158_v35, 2 }
  0x13   :  { %v103_v38 = vrot.slane %v102_v36, 1  ;;  %v160_v39 = vadd.f32 %v159_v37, %v158_v35 }
  0x15   :  { %v104_v40 = vadd.f32 %v103_v38, %v102_v36  ;;  %v161_v41 = vrot.slane %v160_v39, 1 }
  0x17   :  { %vm105_vm2 = vcmp.gt.f32.partialorder %v104_v40, 0.0  ;;  %280 = vrsqrt.f32 %v104_v40  ;;  %v162_v42 = vadd.f32 %v161_v41, %v160_v39 }
  0x18   :  { %v268_v43 = vsel %vm105_vm2, 1.0, %v284_v0 }
  0x19   :  { %v128_v44 = vsel %vm127_vm1, %v268_v43, 0.0  ;;  %vm163_vm3 = vcmp.gt.f32.partialorder %v162_v42, 0.0  ;;  %282 = vrsqrt.f32 %v162_v42 }
  0x1a   :  { %129 = vadd.xlane.f32.xlu0 %v128_v44  ;;  %v269_v45 = vsel %vm163_vm3, 1.0, %v284_v0 }
  0x1b   :  { %v185_v46 = vsel %vm127_vm1, %v269_v45, 0.0 }
  0x1e   :  { %186 = vadd.xlane.f32.xlu0 %v185_v46 }
  0x24   :  { %v281_v47 = vpop.eup %280 }
  0x25   :  { %v107_v52 = vsel %vm105_vm2, %v281_v47, 0.0 }
  0x26   :  { %v283_v53 = vpop.eup %282  ;;  %v108_v54 = vmul.f32 %v107_v52, %v316_v1  ;;  %v109_v55 = vmul.f32 %v107_v52, %v321_v2  ;;  %v110_v56 = vmul.f32 %v107_v52, %v326_v3  ;;  %v111_v57 = vmul.f32 %v107_v52, %v86_v4  ;;  %v182_v52 = vld [vmem:[#allocation5] sm:$0x1] }
  0x27   :  { %v165_v58 = vsel %vm163_vm3, %v283_v53, 0.0 }
  0x28   :  { %v116_v60 = vadd.f32 %v112_v48, %v108_v54  ;;  %v117_v61 = vadd.f32 %v113_v49, %v109_v55  ;;  %v118_v62 = vadd.f32 %v114_v50, %v110_v56  ;;  %v119_v63 = vadd.f32 %v115_v51, %v111_v57  ;;  %v124_v49 = vld [vmem:[#allocation4] sm:$0x1] }
  0x29   :  { %v166_v10 = vmul.f32 %v165_v58, %v348_v8  ;;  %v167_v13 = vmul.f32 %v165_v58, %v353_v9  ;;  %v168_v1 = vmul.f32 %v165_v58, %v358_v11  ;;  %v169_v2 = vmul.f32 %v165_v58, %v363_v12 }
  0x2a   :  { %120 = vst.msk [vmem:[#allocation2] sm:$0xff] %vm71_vm0, %v116_v60  ;;  %121 = vst.msk [vmem:[#allocation2 + $0x8] sm:$0xff] %vm71_vm0, %v117_v61 }
  0x2b   :  { %122 = vst.msk [vmem:[#allocation2 + $0x10] sm:$0xff] %vm71_vm0, %v118_v62  ;;  %123 = vst.msk [vmem:[#allocation2 + $0x18] sm:$0xff] %vm71_vm0, %v119_v63  ;;  %v174_v3 = vadd.f32 %v170_v59, %v166_v10  ;;  %v175_v4 = vadd.f32 %v171_v5, %v167_v13  ;;  %v176_v14 = vadd.f32 %v172_v6, %v168_v1 }
  0x2c   :  { %v177_v15 = vadd.f32 %v173_v7, %v169_v2 }
  0x2d   :  { %178 = vst.msk [vmem:[#allocation3] sm:$0xff] %vm71_vm0, %v174_v3  ;;  %179 = vst.msk [vmem:[#allocation3 + $0x8] sm:$0xff] %vm71_vm0, %v175_v4 }
  0x2e   :  { %180 = vst.msk [vmem:[#allocation3 + $0x10] sm:$0xff] %vm71_vm0, %v176_v14  ;;  %181 = vst.msk [vmem:[#allocation3 + $0x18] sm:$0xff] %vm71_vm0, %v177_v15 }
  0x31   :  { %v201_v8 = vld [vmem:[#allocation2] sm:$0xff]  ;;  %v202_v9 = vld [vmem:[#allocation2 + $0x8] sm:$0xff] }
  0x32   :  { %v203_v11 = vld [vmem:[#allocation2 + $0x10] sm:$0xff]  ;;  %v205_v12 = vsel %vm71_vm0, %v201_v8, 0.0  ;;  %v208_v17 = vsel %vm71_vm0, %v202_v9, 0.0  ;;  %v204_v19 = vld [vmem:[#allocation2 + $0x18] sm:$0xff] }
  0x33   :  { %v211_v16 = vsel %vm71_vm0, %v203_v11, 0.0  ;;  %206 = vadd.xlane.f32.xlu1 %v205_v12  ;;  %v214_v22 = vsel %vm71_vm0, %v204_v19, 0.0 }
  0x34   :  { %212 = vadd.xlane.f32.xlu0 %v211_v16  ;;  %v222_v18 = vld [vmem:[#allocation3] sm:$0xff]  ;;  %v223_v24 = vld [vmem:[#allocation3 + $0x8] sm:$0xff] }
  0x35   :  { %v226_v20 = vsel %vm71_vm0, %v222_v18, 0.0  ;;  %v224_v21 = vld [vmem:[#allocation3 + $0x10] sm:$0xff]  ;;  %v229_v25 = vsel %vm71_vm0, %v223_v24, 0.0  ;;  %v225_v26 = vld [vmem:[#allocation3 + $0x18] sm:$0xff] }
  0x36   :  { %v232_v23 = vsel %vm71_vm0, %v224_v21, 0.0  ;;  %v235_v27 = vsel %vm71_vm0, %v225_v26, 0.0 }
  0x37   :  { %209 = vadd.xlane.f32.xlu1 %v208_v17 }
  0x38   :  { %227 = vadd.xlane.f32.xlu0 %v226_v20 }
  0x3b   :  { %215 = vadd.xlane.f32.xlu1 %v214_v22 }
  0x3c   :  { %233 = vadd.xlane.f32.xlu0 %v232_v23 }
  0x3f   :  { %230 = vadd.xlane.f32.xlu1 %v229_v25 }
  0x43   :  { %236 = vadd.xlane.f32.xlu1 %v235_v27 }
  0xa3   :  { %v130_v28 = vpop.xlane.xlu0 %129 }
  0xa4   :  { %v131_v29 = vrot.slane %v130_v28, 4 }
  0xa6   :  { %v132_v30 = vadd.f32 %v131_v29, %v130_v28 }
  0xa7   :  { %v187_v31 = vpop.xlane.xlu0 %186 }
  0xa8   :  { %v133_v32 = vrot.slane %v132_v30, 2  ;;  %v188_v33 = vrot.slane %v187_v31, 4 }
  0xaa   :  { %v189_v34 = vadd.f32 %v188_v33, %v187_v31  ;;  %v134_v35 = vadd.f32 %v133_v32, %v132_v30 }
  0xac   :  { %v190_v36 = vrot.slane %v189_v34, 2  ;;  %v135_v37 = vrot.slane %v134_v35, 1 }
  0xae   :  { %v136_v38 = vadd.f32 %v135_v37, %v134_v35  ;;  %v191_v39 = vadd.f32 %v190_v36, %v189_v34 }
  0xb0   :  { %275 = vpush %v136_v38  ;;  %v192_v40 = vrot.slane %v191_v39, 1 }
  0xb2   :  { %v193_v41 = vadd.f32 %v192_v40, %v191_v39 }
  0xb4   :  { %277 = vpush %v193_v41 }
  0xbc   :  { %v207_v0 = vpop.xlane.xlu1 %206 }
  0xbd   :  { %v213_v42 = vpop.xlane.xlu0 %212  ;;  %218 = vst.msk [vmem:[%s458_s2] sm:$0xff] %vm217_vm5, %v207_v0 }
  0xbe   :  { %220 = vst.msk [vmem:[%s458_s2 + $0x10] sm:$0xff] %vm217_vm5, %v213_v42 }
  0xc0   :  { %v210_v43 = vpop.xlane.xlu1 %209 }
  0xc1   :  { %v228_v44 = vpop.xlane.xlu0 %227  ;;  %219 = vst.msk [vmem:[%s458_s2 + $0x8] sm:$0xff] %vm217_vm5, %v210_v43 }
  0xc2   :  { %270 = vst.msk [vmem:[%s458_s2 + $0x20] sm:$0xff] %vm217_vm5, %v228_v44 }
  0xc4   :  { %v216_v45 = vpop.xlane.xlu1 %215 }
  0xc5   :  { %v234_v46 = vpop.xlane.xlu0 %233  ;;  %221 = vst.msk [vmem:[%s458_s2 + $0x18] sm:$0xff] %vm217_vm5, %v216_v45 }
  0xc6   :  { %272 = vst.msk [vmem:[%s458_s2 + $0x30] sm:$0xff] %vm217_vm5, %v234_v46 }
  0xc8   :  { %v231_v47 = vpop.xlane.xlu1 %230 }
  0xc9   :  { %271 = vst.msk [vmem:[%s458_s2 + $0x28] sm:$0xff] %vm217_vm5, %v231_v47 }
  0xcc   :  { %v237_v48 = vpop.xlane.xlu1 %236 }
  0xcd   :  { %273 = vst.msk [vmem:[%s458_s2 + $0x38] sm:$0xff] %vm217_vm5, %v237_v48 }
  0xe1   :  { %s276_s15 = spop %275 }
  0xe2   :  { %v138_v50 = vstv %s276_s15 }
  0xe3   :  { %v139_v51 = vadd.f32 %v138_v50, %v124_v49 }
  0xe5   :  { %141 = vst.msk [vmem:[#allocation4] sm:$0x1] %vm80_vm4, %v139_v51  ;;  %s278_s16 = spop %277 }
  0xe6   :  { %v195_v53 = vstv %s278_s16 }
  0xe7   :  { %v196_v54 = vadd.f32 %v195_v53, %v182_v52 }
  0xe9   :  { %197 = vst.msk [vmem:[#allocation5] sm:$0x1] %vm80_vm4, %v196_v54 }
  0xec   :  { %v243_v55 = vld [vmem:[#allocation4] sm:$0x1] }
  0xed   :  { %244 = vst.msk [vmem:[%s459_s3] sm:$0x1] %vm80_vm4, %v243_v55 }
  0xf0   :  { %v245_v56 = vld [vmem:[#allocation5] sm:$0x1] }
  0xf1   :  { %274 = vst.msk [vmem:[%s459_s3 + $0x1] sm:$0x1] %vm80_vm4, %v245_v56 }

</bundles_post_ra>
